<compile_context>
chip_gen: v6e
topology: v6e:2x2x1
jax: 0.10.0
libtpu: 0.0.40
codegen_flags: <defaults>
</compile_context>

<pallas_src>
import jax
import jax.numpy as jnp
from jax.experimental import pallas as pl
from jax.experimental.pallas import tpu as pltpu

_LANES = 128
_MIN_BLK_ROWS = 256        # 256 x 128 x 4B = 128 KiB f32 block floor (overhead amortization)
_TARGET_STEPS = 8          # aim for ~8 grid steps so DMA/compute overlap + megacore sharding
_FASTPATH_ELEMS = 65536    # below this, XLA's fused elementwise path beats a Pallas launch


def _round_up(x: int, m: int) -> int:
    return ((x + m - 1) // m) * m


def _max_blk_rows() -> int:
    """Per-generation block cap (gated so v5e never exceeds its 16 MiB scoped VMEM)."""
    try:
        kind = jax.devices()[0].device_kind.lower()
    except Exception:
        kind = ""
    if "v7" in kind:
        # 4 MiB per f32 buffer; ~24 MiB live with 2 inputs + 1 output double-
        # buffered -> fits v7x's 32 MiB scoped-VMEM default; bigger steps
        # amortize the fixed per-step overhead against ~3.2 TB/s HBM.
        return 8192
    # 2 MiB per f32 buffer; ~12 MiB live -> fits v5e's 16 MiB scoped-VMEM
    # default; v5e/v6e are already near HBM roofline at this block size.
    return 4096


def _bernoulli_logprob_kernel(logits_ref, target_ref, out_ref):
    # Cast to f32 on the VPU (kernel is purely HBM-bound; VPU slack is huge).
    x = logits_ref[...].astype(jnp.float32)
    t = target_ref[...].astype(jnp.float32)
    # Numerically-stable BCE-with-logits; store the negative in caller dtype.
    loss = jnp.maximum(x, 0.0) - x * t + jnp.log1p(jnp.exp(-jnp.abs(x)))
    out_ref[...] = (-loss).astype(out_ref.dtype)


def _neg_bce_jnp(x, t, out_dtype):
    """Fused jnp fallback (fast path for tiny inputs and the <128-elem tail)."""
    x = x.astype(jnp.float32)
    t = t.astype(jnp.float32)
    out = -(jnp.maximum(x, 0.0) - x * t + jnp.log1p(jnp.exp(-jnp.abs(x))))
    return out.astype(out_dtype)


def bernoulli_log_prob(logits: jax.Array, target: jax.Array) -> jax.Array:
    """-(BCEWithLogitsLoss(reduction='none')(logits, target)), elementwise."""
    assert logits.shape == target.shape, "mismatched shapes not supported"
    orig_shape = logits.shape
    out_dtype = logits.dtype
    if not jnp.issubdtype(out_dtype, jnp.floating):
        out_dtype = jnp.float32

    n = int(logits.size)
    if n == 0:
        return jnp.zeros(orig_shape, out_dtype)

    # Fast path: tiny inputs — Pallas launch overhead would dominate.
    if n < _FASTPATH_ELEMS:
        return _neg_bce_jnp(logits, target, out_dtype)

    x_flat = logits.reshape(-1)   # zero-copy flatten
    t_flat = target.reshape(-1)

    tail = n % _LANES
    n_main = n - tail
    rows = n_main // _LANES       # >= 512 given the fast-path threshold

    # Block rows: multiple of 8, aim for ~_TARGET_STEPS grid steps, clamp to
    # [_MIN_BLK_ROWS, per-generation cap].
    blk_rows = _round_up(pl.cdiv(rows, _TARGET_STEPS), 8)
    blk_rows = min(_max_blk_rows(), max(_MIN_BLK_ROWS, blk_rows))
    grid = (pl.cdiv(rows, blk_rows),)   # last block may be partial (masked stores)

    x2d = (x_flat[:n_main] if tail else x_flat).reshape(rows, _LANES)
    t2d = (t_flat[:n_main] if tail else t_flat).reshape(rows, _LANES)

    block = (blk_rows, _LANES)
    in_spec = pl.BlockSpec(block, lambda i: (i, 0))
    out_spec = pl.BlockSpec(block, lambda i: (i, 0))

    out2d = pl.pallas_call(
        _bernoulli_logprob_kernel,
        out_shape=jax.ShapeDtypeStruct((rows, _LANES), out_dtype),
        grid_spec=pltpu.PrefetchScalarGridSpec(
            num_scalar_prefetch=0,
            grid=grid,
            in_specs=[in_spec, in_spec],
            out_specs=out_spec,
        ),
        compiler_params=pltpu.CompilerParams(
            dimension_semantics=("parallel",),
        ),
    )(x2d, t2d)

    out_flat = out2d.reshape(-1)
    if tail:
        # <128-element tail computed with fused jnp (no whole-array pad/slice).
        out_tail = _neg_bce_jnp(x_flat[n_main:], t_flat[n_main:], out_dtype)
        out_flat = jnp.concatenate([out_flat, out_tail])
    return out_flat.reshape(orig_shape)


def _reference(logits, target, out_dtype=None):
    if out_dtype is None:
        out_dtype = logits.dtype
    return _neg_bce_jnp(logits, target, out_dtype)


def _check(out, ref, atol, name):
    assert out.shape == ref.shape, f"{name}: shape mismatch"
    ok = jnp.allclose(out.astype(jnp.float32), ref.astype(jnp.float32),
                      atol=atol, rtol=atol)
    assert ok, f"{name}: mismatch vs reference"


if __name__ == "__main__":
    key = jax.random.PRNGKey(0)
    keys = jax.random.split(key, 10)

    # 1) Small NCHW-like shape consistent with the module (fast path).
    shape = (2, 4, 16, 16)
    logits = jax.random.normal(keys[0], shape, dtype=jnp.float32) * 3.0
    target = (jax.random.uniform(keys[1], shape) > 0.5).astype(jnp.float32)
    out = jax.block_until_ready(bernoulli_log_prob(logits, target))
    _check(out, _reference(logits, target), 1e-5, "small aligned")
    assert out.dtype == logits.dtype

    # 2) Ragged tiny shape (fast path).
    shape2 = (3, 5, 7)
    logits2 = jax.random.normal(keys[2], shape2, dtype=jnp.float32) * 3.0
    target2 = (jax.random.uniform(keys[3], shape2) > 0.5).astype(jnp.float32)
    out2 = jax.block_until_ready(bernoulli_log_prob(logits2, target2))
    _check(out2, _reference(logits2, target2), 1e-5, "small ragged")

    # 3) Lane-aligned shape large enough to exercise the Pallas kernel
    #    (131072 elems -> rows=1024, blk=256, grid=4 steps).
    shape3 = (8, 4, 64, 64)
    logits3 = jax.random.normal(keys[4], shape3, dtype=jnp.float32) * 3.0
    target3 = (jax.random.uniform(keys[5], shape3) > 0.5).astype(jnp.float32)
    out3 = jax.block_until_ready(bernoulli_log_prob(logits3, target3))
    _check(out3, _reference(logits3, target3), 1e-5, "pallas aligned")

    # 4) Ragged large shape: Pallas prefix + jnp tail + partial last block.
    shape4 = (5, 7, 31, 61)   # 66185 elems = 517*128 + 9
    logits4 = jax.random.normal(keys[6], shape4, dtype=jnp.float32) * 3.0
    target4 = (jax.random.uniform(keys[7], shape4) > 0.5).astype(jnp.float32)
    out4 = jax.block_until_ready(bernoulli_log_prob(logits4, target4))
    _check(out4, _reference(logits4, target4), 1e-5, "pallas ragged")

    # 5) Narrow dtypes: bf16 logits + bool target, no wrapper upcasting.
    shape5 = (16, 4, 32, 32)  # 65536 elems -> Pallas path
    logits5 = (jax.random.normal(keys[8], shape5, dtype=jnp.float32) * 3.0
               ).astype(jnp.bfloat16)
    target5 = jax.random.uniform(keys[9], shape5) > 0.5   # bool
    out5 = jax.block_until_ready(bernoulli_log_prob(logits5, target5))
    assert out5.dtype == jnp.bfloat16
    _check(out5, _reference(logits5, target5, jnp.bfloat16), 2e-2, "pallas bf16/bool")

    print("KERNEL_OK")
</pallas_src>

<mosaic_0001>
module attributes {stable_mosaic.version = 11 : i64} {
  func.func @_bernoulli_logprob_kernel(%arg0: i32, %arg1: memref<256x128xf32, #tpu.memory_space<vmem>>, %arg2: memref<256x128xf32, #tpu.memory_space<vmem>>, %arg3: memref<256x128xf32, #tpu.memory_space<vmem>>) attributes {dimension_semantics = [#tpu.dimension_semantics<parallel>], iteration_bounds = array<i64: 4>, scalar_prefetch = 0 : i64, scratch_operands = 0 : i64, tpu.core_type = #tpu.core_type<tc>, window_params = [{transform_indices = @transform_0, window_bounds = array<i64: 256, 128>}, {transform_indices = @transform_1, window_bounds = array<i64: 256, 128>}, {transform_indices = @transform_2, window_bounds = array<i64: 256, 128>}]} {
    %c0 = arith.constant 0 : index
    %c0_0 = arith.constant 0 : index
    %0 = vector.load %arg1[%c0, %c0_0] : memref<256x128xf32, #tpu.memory_space<vmem>>, vector<256x128xf32>
    %c0_1 = arith.constant 0 : index
    %c0_2 = arith.constant 0 : index
    %1 = vector.load %arg2[%c0_1, %c0_2] : memref<256x128xf32, #tpu.memory_space<vmem>>, vector<256x128xf32>
    %cst = arith.constant 0.000000e+00 : f32
    %2 = vector.broadcast %cst : f32 to vector<256x128xf32>
    %3 = arith.maximumf %0, %2 : vector<256x128xf32>
    %4 = arith.mulf %0, %1 : vector<256x128xf32>
    %5 = arith.subf %3, %4 : vector<256x128xf32>
    %6 = math.absf %0 : vector<256x128xf32>
    %cst_3 = arith.constant 0.000000e+00 : f32
    %7 = vector.broadcast %cst_3 : f32 to vector<256x128xf32>
    %8 = arith.subf %7, %6 : vector<256x128xf32>
    %9 = math.exp %8 : vector<256x128xf32>
    %10 = math.log1p %9 : vector<256x128xf32>
    %11 = arith.addf %5, %10 : vector<256x128xf32>
    %cst_4 = arith.constant 0.000000e+00 : f32
    %12 = vector.broadcast %cst_4 : f32 to vector<256x128xf32>
    %13 = arith.subf %12, %11 : vector<256x128xf32>
    %c0_5 = arith.constant 0 : index
    %c0_6 = arith.constant 0 : index
    %14 = vector.load %arg3[%c0_5, %c0_6] : memref<256x128xf32, #tpu.memory_space<vmem>>, vector<256x128xf32>
    tpu.vector_store %arg3[%c0_5, %c0_6], %13 {strides = array<i32>} : memref<256x128xf32, #tpu.memory_space<vmem>>, vector<256x128xf32>,
    return
  }
  func.func @transform_0(%arg0: i32) -> (i32, i32) {
    %c0_i32 = arith.constant 0 : i32
    %c0_i32_0 = arith.constant 0 : i32
    return %arg0, %c0_i32 : i32, i32
  }
  func.func @transform_1(%arg0: i32) -> (i32, i32) {
    %c0_i32 = arith.constant 0 : i32
    %c0_i32_0 = arith.constant 0 : i32
    return %arg0, %c0_i32 : i32, i32
  }
  func.func @transform_2(%arg0: i32) -> (i32, i32) {
    %c0_i32 = arith.constant 0 : i32
    %c0_i32_0 = arith.constant 0 : i32
    return %arg0, %c0_i32 : i32, i32
  }
}

</mosaic_0001>

<bundles_post_ra>
// kernel: tpu_custom_call.1
= control target key start
LH: loop header
LB: loop body
LE: loop exit
PB: predicated region body
PF: predicated region fallthrough
CT: control target
= control target key end

     0   :  { %7 = vsyncpa [#allocation3], 0  ;;  %s2178_s0 = inlined_call_operand.hbm [shape: f32[1024,128], index: 0, kind: input, shape index: {}]   ;;  %s2179_s1 = inlined_call_operand.hbm [shape: f32[1024,128], index: 1, kind: input, shape index: {}]   ;;  %s2180_s2 = inlined_call_operand.hbm [shape: f32[1024,128], index: 2, kind: output, shape index: {}]  }
   0x1   :  { %9 = vsyncpa [#allocation3 + $0x1], 0 }
   0x2   :  { %10 = vsyncpa [#allocation6], 0 }
   0x3   :  { %12 = vsyncpa [#allocation6 + $0x1], 0 }
   0x4   :  { %13 = vsyncpa [#allocation4], 0 }
   0x5   :  { %15 = vsyncpa [#allocation4 + $0x1], 0  ;;  %s1339_s9 = smov 0   ;;  %s1341_s10 = smov 0  }
   0x6   :  { %s1343_s11 = smov 0   ;;  %s1345_s12 = smov 0  }
   0x7 LB: > { %s1360_s13 = sadd.s32 4294967295, %s1315_s12   ;;  %s987_s14 = sadd.s32 4294967294, %s1315_s12   ;;  %s1315_s12 = sphi %s1345_s12, %s2249_s12   ;;  %s1311_s11 = sphi %s1343_s11, %s2248_s11   ;;  %s1307_s10 = sphi %s1341_s10, %s2247_s10   ;;  %s1303_s9 = sphi %s1339_s9, %s2246_s9  }
   0x8   : > { %s1364_s15 = sadd.s32 1, %s1315_s12   ;;  %s28_s16 = sadd.s32 1, %s1311_s11 }
   0x9   : > { %s25_s17 = ssub.s32 %s1315_s12, %s1364_s15  ;;  %p35_p0 = scmp.ne.s32.totalorder %s1311_s11, %s1307_s10 }
   0xa   : > { %p26_p1 = scmp.eq.s32.totalorder %s25_s17, 0  ;;  %p36_p2 = scmp.eq.s32.totalorder %s1315_s12, 0 }
   0xb   : > { %p41_p3 = scmp.ne.s32.totalorder %s1307_s10, %s1303_s9  ;;  %p42_p4 = scmp.eq.s32.totalorder %s1360_s13, 0 }
   0xc   : > { %s1376_s18 = scalar_select %p26_p1, %s1311_s11, %s28_s16  }
   0xd   : > { %p1378_p5 = por %p36_p2, %p35_p0  ;;  %p1382_p6 = por %p42_p4, %p41_p3 }
   0xe   : > { %p91_p7 = scmp.eq.s32.totalorder %s1360_s13, 3  ;;  %p97_p8 = scmp.eq.s32.totalorder %s987_s14, 3 }
   0xf   : > { %s2184_s20 = scalar_select %p1382_p6, 1, 0 }
  0x10   : > { %p1025_p9 = scmp.lt.s32.totalorder %s1315_s12, 4  ;;  %p1388_p10 = por %p91_p7, %p35_p0 }
  0x11   : > { %p1392_p11 = por %p97_p8, %p41_p3  ;;  %s1397_s23 = sand.u32 1, %s1311_s11  }
  0x12   : > { %s2185_s21 = scalar_select %p1388_p10, 1, 0 }
  0x13   : > { %s2186_s22 = scalar_select %p1392_p11, 1, 0 }
  0x14   : > { %s1005_s24 = sshll.u32 %s1315_s12, 12  ;;  %s990_s25 = sshll.u32 %s1397_s23, 8 }
  0x15   : > { %s1406_s28 = scalar_lea.hbm %s2178_s0, %s1005_s24  ;;  %s121_s29 = scalar_lea.vmem [#allocation2], %s990_s25 }
  0x16   : > { %s128_s30 = sshll.u32 %s121_s29, 4  ;;  %p1412_p12 = pnand %p1025_p9, %p1378_p5  ;;  %s1416_s30 = int_to_ptr.vmem [resolvable:$true] %s128_s30 }
  0x17   : > { %s118_s4 = scalar_lea.sflag [#allocation3], %s1397_s23  ;;  %s1191_s5 = scalar_lea.hbm %s1406_s28, 4096 }
  0x18   : > { %p1192_p13 = scmp.ne.s32.totalorder %s1406_s28, %s1191_s5  ;;  %p1193_p0 = pneg %p1412_p12 }
  0x19   : > { %s1196_s8 = scalar_lea.hbm %s2178_s0, 16384  ;;  %p1197_p3 = scmp.lt.s32.totalorder %s1406_s28, %s2178_s0 }
  0x1a   : > { %p1194_p1 = pnand %p1193_p0, %p1192_p13  ;;  %p1198_p4 = scmp.lt.s32.totalorder %s1196_s8, %s1191_s5 }
  0x1c   : > { %p1195_p2 = pneg %p1194_p1  ;;  %p1199_p5 = por %p1198_p4, %p1197_p3 }
  0x1e   : > { %p1200_p7 = pnand %p1199_p5, %p1195_p2 }
  0x20   : > { %1203 = shalt.err (!%p1200_p7)
}
  0x21   : > { %s1204_s17 = scalar_lea.vmem %s1416_s30, 4096  ;;  %s1317_s19 = smov [#allocation2]  }
  0x22   : > { %p1205_p8 = scmp.ne.s32.totalorder %s1416_s30, %s1204_s17  ;;  %s1209_s26 = sshll.u32 %s1317_s19, 4  ;;  %s1210_s26 = int_to_ptr.vmem [resolvable:$false] %s1209_s26 }
  0x23   : > { %s1211_s27 = scalar_lea.vmem %s1210_s26, 8192  ;;  %p1212_p1 = scmp.lt.s32.totalorder %s1416_s30, %s1210_s26 }
  0x24   : > { %p1207_p9 = pnand %p1205_p8, %p1193_p0  ;;  %p1213_p11 = scmp.lt.s32.totalorder %s1211_s27, %s1204_s17 }
  0x26   : > { %p1208_p13 = pneg %p1207_p9  ;;  %p1214_p10 = por %p1213_p11, %p1212_p1 }
  0x28   : > { %p1215_p3 = pnand %p1214_p10, %p1208_p13 }
  0x2a   : > { %1218 = shalt.err (!%p1215_p3)
}
  0x2b   : > { %s1318_s29 = smov 128   ;;  %s1319_s5 = smov 8  }
  0x2c   : > { %1017 = dma.hbm_to_vmem [thread:$0]  (!%p1412_p12), %s1406_s28, 4096, %s1416_s30, %s118_s4, %s1318_s29, %s1318_s29, %s1319_s5  }
  0x2d   : > { %p996_p10 = scmp.ge.s32.totalorder %s1315_s12, 1  ;;  %p157_p11 = scmp.lt.s32.totalorder %s1315_s12, 5 }
  0x2e   : > { %s1459_s14 = scalar_lea.hbm %s2179_s1, %s1005_s24  ;;  %s142_s16 = scalar_lea.vmem [#allocation5], %s990_s25 }
  0x2f   : > { %p1450_p2 = pnand %p996_p10, %p157_p11  ;;  %s149_s17 = sshll.u32 %s142_s16, 4  ;;  %s1463_s17 = int_to_ptr.vmem [resolvable:$true] %s149_s17 }
  0x30   : > { %s139_s28 = scalar_lea.sflag [#allocation6], %s1397_s23  ;;  %s1219_s30 = scalar_lea.hbm %s1459_s14, 4096 }
  0x31   : > { %p1220_p4 = scmp.ne.s32.totalorder %s1459_s14, %s1219_s30  ;;  %s1224_s24 = scalar_lea.hbm %s2179_s1, 16384 }
  0x32   : > { %p1225_p8 = scmp.lt.s32.totalorder %s1459_s14, %s2179_s1  ;;  %p1226_p9 = scmp.lt.s32.totalorder %s1224_s24, %s1219_s30 }
  0x33   : > { %p1222_p5 = pnand %p1220_p4, %p1193_p0 }
  0x34   : > { %p1227_p13 = por %p1226_p9, %p1225_p8 }
  0x35   : > { %p1223_p7 = pneg %p1222_p5 }
  0x37   : > { %p1228_p1 = pnand %p1227_p13, %p1223_p7 }
  0x39   : > { %1231 = shalt.err (!%p1228_p1)
}
  0x3a   : > { %s1232_s23 = scalar_lea.vmem %s1463_s17, 4096  ;;  %s1320_s25 = smov [#allocation5]  }
  0x3b   : > { %p1233_p3 = scmp.ne.s32.totalorder %s1463_s17, %s1232_s23  ;;  %s1237_s7 = sshll.u32 %s1320_s25, 4  ;;  %s1238_s7 = int_to_ptr.vmem [resolvable:$false] %s1237_s7 }
  0x3c   : > { %s1239_s8 = scalar_lea.vmem %s1238_s7, 8192  ;;  %p1240_p4 = scmp.lt.s32.totalorder %s1463_s17, %s1238_s7 }
  0x3d   : > { %p1235_p10 = pnand %p1233_p3, %p1193_p0  ;;  %p1241_p5 = scmp.lt.s32.totalorder %s1239_s8, %s1232_s23 }
  0x3f   : > { %p1236_p11 = pneg %p1235_p10  ;;  %p1242_p6 = por %p1241_p5, %p1240_p4 }
  0x41   : > { %p1243_p8 = pnand %p1242_p6, %p1236_p11 }
  0x43   : > { %1246 = shalt.err (!%p1243_p8)
}
  0x44   : > { %1020 = dma.hbm_to_vmem [thread:$0]  (!%p1412_p12), %s1459_s14, 4096, %s1463_s17, %s139_s28, %s1318_s29, %s1318_s29, %s1319_s5  }
  0x45   : > { %161 = sbr.rel (%p1450_p2) target bundleno = 252 (0xfc), region = 28  ;;  %s1494_s16 = sand.u32 (!%p1450_p2), 1, %s1307_s10  }
  0x46   : > { %s1497_s30 = sshll.u32 (!%p1450_p2), %s1494_s16, 8  ;;  %s164_s4 = scalar_lea.sflag (!%p1450_p2), [#allocation3], %s1494_s16 }
  0x47   : > { %s1501_s3 = scalar_lea.vmem (!%p1450_p2), [#allocation2], %s1497_s30  ;;  %p2189_p6 = scmp.ne.s32.totalorder (!%p1450_p2), %s2184_s20, 0 }
  0x4a   : > { %1290 = dma.done.wait (%p2189_p6), %s164_s4, 4096  }
  0x4b   : > { %1292 = vsyncadd (%p2189_p6), %s164_s4, 4294963200  ;;  %s173_s29 = scalar_lea.sflag [#allocation6], %s1494_s16  ;;  %s1509_s5 = scalar_lea.vmem [#allocation5], %s1497_s30 }
  0x4c   : > { %1294 = dma.done.wait (%p2189_p6), %s173_s29, 4096  }
  0x4d   : > { %1296 = vsyncadd (%p2189_p6), %s173_s29, 4294963200  ;;  %v1516_v0 = vld [vmem:[%s1501_s3] sm:$0xff]  ;;  %v1519_v1 = vld [vmem:[%s1501_s3 + $0x8] sm:$0xff]  ;;  %s1672_s20 = scalar_lea.vmem [#allocation7], %s1497_s30  ;;  %s1007_s6 = sshll.u32 %s1360_s13, 12 }
  0x4e   : > { %v365_v2 = vand.u32 2147483647, %v1516_v0  ;;  %v1523_v3 = vld [vmem:[%s1501_s3 + $0x10] sm:$0xff]  ;;  %v366_v4 = vand.u32 2147483647, %v1519_v1  ;;  %v1528_v7 = vld [vmem:[%s1501_s3 + $0x18] sm:$0xff]  ;;  %s2133_s19 = scalar_lea.hbm %s2180_s2, %s1007_s6 }
  0x4f   : > { %v367_v5 = vand.u32 2147483647, %v1523_v3  ;;  %v1531_v10 = vld [vmem:[%s1501_s3 + $0x20] sm:$0xff]  ;;  %v368_v12 = vand.u32 2147483647, %v1528_v7  ;;  %v1535_v15 = vld [vmem:[%s1501_s3 + $0x28] sm:$0xff] }
  0x50   : > { %v397_v6 = vsub.f32 0.0, %v365_v2  ;;  %v398_v8 = vsub.f32 0.0, %v366_v4  ;;  %v237_v16 = vld [vmem:[%s1509_s5] sm:$0xff]  ;;  %v369_v18 = vand.u32 2147483647, %v1531_v10  ;;  %v1540_v19 = vld [vmem:[%s1501_s3 + $0x30] sm:$0xff] }
  0x51   : > { %v399_v9 = vsub.f32 0.0, %v367_v5  ;;  %v400_v17 = vsub.f32 0.0, %v368_v12  ;;  %v238_v20 = vld [vmem:[%s1509_s5 + $0x8] sm:$0xff]  ;;  %v239_v21 = vld [vmem:[%s1509_s5 + $0x10] sm:$0xff]  ;;  %v370_v24 = vand.u32 2147483647, %v1535_v15  ;;  %v301_v27 = vmul.f32 %v237_v16, %v1516_v0 }
  0x52   : > { %v429_v11 = vmul.f32 1.442695, %v397_v6  ;;  %v431_v13 = vmul.f32 1.442695, %v398_v8  ;;  %v401_v23 = vsub.f32 0.0, %v369_v18  ;;  %v1546_v25 = vld [vmem:[%s1501_s3 + $0x38] sm:$0xff]  ;;  %v302_v31 = vmul.f32 %v238_v20, %v1519_v1 }
  0x53   : > { %v433_v14 = vmul.f32 1.442695, %v399_v9  ;;  %v435_v22 = vmul.f32 1.442695, %v400_v17  ;;  %v269_v26 = vmax.f32 %v1516_v0, 0.0  ;;  %v270_v28 = vmax.f32 %v1519_v1, 0.0 }
  0x54   : > { %1063 = vpow2.f32 %v429_v11  ;;  %v240_v29 = vld [vmem:[%s1509_s5 + $0x18] sm:$0xff]  ;;  %v371_v30 = vand.u32 2147483647, %v1540_v19  ;;  %v437_v32 = vmul.f32 1.442695, %v401_v23  ;;  %v402_v33 = vsub.f32 0.0, %v370_v24 }
  0x55   : > { %1065 = vpow2.f32 %v431_v13  ;;  %v1555_v34 = vld [vmem:[%s1501_s3 + $0x40] sm:$0xff]  ;;  %v271_v35 = vmax.f32 %v1523_v3, 0.0  ;;  %v303_v36 = vmul.f32 %v239_v21, %v1523_v3  ;;  %v242_v38 = vld [vmem:[%s1509_s5 + $0x28] sm:$0xff]  ;;  %v372_v40 = vand.u32 2147483647, %v1546_v25  ;;  %v243_v44 = vld [vmem:[%s1509_s5 + $0x30] sm:$0xff] }
  0x56   : > { %1067 = vpow2.f32 %v433_v14  ;;  %v241_v37 = vld [vmem:[%s1509_s5 + $0x20] sm:$0xff]  ;;  %v403_v39 = vsub.f32 0.0, %v371_v30  ;;  %v272_v41 = vmax.f32 %v1528_v7, 0.0  ;;  %v304_v42 = vmul.f32 %v240_v29, %v1528_v7  ;;  %v1566_v45 = vld [vmem:[%s1501_s3 + $0x48] sm:$0xff]  ;;  %v244_v53 = vld [vmem:[%s1509_s5 + $0x38] sm:$0xff]  ;;  %s891_s14 = sshll.u32 %s1672_s20, 4  ;;  %s2135_s14 = int_to_ptr.vmem [resolvable:$true] %s891_s14 }
  0x57   : > { %1069 = vpow2.f32 %v435_v22  ;;  %v439_v43 = vmul.f32 1.442695, %v402_v33  ;;  %v273_v46 = vmax.f32 %v1531_v10, 0.0  ;;  %v404_v48 = vsub.f32 0.0, %v372_v40  ;;  %v1576_v57 = vld [vmem:[%s1501_s3 + $0x50] sm:$0xff]  ;;  %v245_v63 = vld [vmem:[%s1509_s5 + $0x40] sm:$0xff] }
  0x58   : > { %1071 = vpow2.f32 %v437_v32  ;;  %v441_v47 = vmul.f32 1.442695, %v403_v39  ;;  %v373_v49 = vand.u32 2147483647, %v1555_v34  ;;  %v305_v50 = vmul.f32 %v241_v37, %v1531_v10  ;;  %v1604_v23 = vld [vmem:[%s1501_s3 + $0x58] sm:$0xff]  ;;  %s878_s24 = scalar_lea.sflag [#allocation4], %s1494_s16 }
  0x59   : > { %v274_v51 = vmax.f32 %v1535_v15, 0.0  ;;  %v306_v52 = vmul.f32 %v242_v38, %v1535_v15  ;;  %1073 = vpow2.f32 %v439_v43  ;;  %v443_v54 = vmul.f32 1.442695, %v404_v48  ;;  %v246_v15 = vld [vmem:[%s1509_s5 + $0x48] sm:$0xff]  ;;  %s1247_s26 = scalar_lea.vmem %s2135_s14, 4096  ;;  %p2244_p0 = scmp.ne.s32.totalorder %s2185_s21, 0 }
  0x5a   : > { %1075 = vpow2.f32 %v441_v47  ;;  %v405_v55 = vsub.f32 0.0, %v373_v49  ;;  %v374_v56 = vand.u32 2147483647, %v1566_v45  ;;  %v1578_v58 = vsub.f32 %v269_v26, %v301_v27  ;;  %p1248_p12 = scmp.ne.s32.totalorder %s2135_s14, %s1247_s26  ;;  %s1321_s13 = smov [#allocation7]  }
  0x5b   : > { %v1580_v59 = vsub.f32 %v270_v28, %v302_v31  ;;  %v275_v60 = vmax.f32 %v1540_v19, 0.0  ;;  %v307_v61 = vmul.f32 %v243_v44, %v1540_v19  ;;  %v1584_v62 = vsub.f32 %v271_v35, %v303_v36  ;;  %s1251_s27 = sshll.u32 %s1321_s13, 4  ;;  %s1252_s27 = int_to_ptr.vmem [resolvable:$false] %s1251_s27 }
  0x5c   : > { %1077 = vpow2.f32 %v443_v54  ;;  %v445_v0 = vmul.f32 1.442695, %v405_v55  ;;  %v406_v1 = vsub.f32 0.0, %v374_v56  ;;  %v1587_v2 = vsub.f32 %v272_v41, %v304_v42  ;;  %p1249_p2 = pnand %p1248_p12, %p2244_p0  ;;  %s1253_s23 = scalar_lea.vmem %s1252_s27, 8192 }
  0x5d   : > { %v276_v3 = vmax.f32 %v1546_v25, 0.0  ;;  %v308_v4 = vmul.f32 %v244_v53, %v1546_v25  ;;  %v375_v5 = vand.u32 2147483647, %v1576_v57  ;;  %v1592_v7 = vsub.f32 %v273_v46, %v305_v50  ;;  %p1254_p9 = scmp.lt.s32.totalorder %s2135_s14, %s1252_s27  ;;  %p1255_p13 = scmp.lt.s32.totalorder %s1253_s23, %s1247_s26 }
  0x5e   : > { %v1594_v8 = vsub.f32 %v274_v51, %v306_v52  ;;  %1079 = vpow2.f32 %v445_v0  ;;  %v447_v9 = vmul.f32 1.442695, %v406_v1  ;;  %v1596_v12 = vsub.f32 %v275_v60, %v307_v61  ;;  %p1250_p7 = pneg %p1249_p2 }
  0x5f   : > { %v277_v13 = vmax.f32 %v1555_v34, 0.0  ;;  %v309_v14 = vmul.f32 %v245_v63, %v1555_v34  ;;  %v1601_v21 = vsub.f32 %v276_v3, %v308_v4  ;;  %v407_v22 = vsub.f32 0.0, %v375_v5  ;;  %p1256_p1 = por %p1255_p13, %p1254_p9 }
  0x60   : > { %1081 = vpow2.f32 %v447_v9  ;;  %v278_v26 = vmax.f32 %v1566_v45, 0.0  ;;  %v310_v27 = vmul.f32 %v246_v15, %v1566_v45  ;;  %v376_v35 = vand.u32 2147483647, %v1604_v23 }
  0x61   : > { %v1064_v6 = vpop.eup %1063  ;;  %v1608_v34 = vsub.f32 %v277_v13, %v309_v14  ;;  %v449_v38 = vmul.f32 1.442695, %v407_v22  ;;  %p1257_p3 = pnand %p1256_p1, %p1250_p7 }
  0x62   : > { %v1066_v10 = vpop.eup %1065  ;;  %v493_v11 = vadd.f32 1.0, %v1064_v6  ;;  %v496_v17 = vmul.f32 -0.5, %v1064_v6  ;;  %v499_v25 = vand.u32 2147483647, %v1064_v6  ;;  %v1615_v43 = vsub.f32 %v278_v26, %v310_v27 }
  0x63   : > { %v1068_v16 = vpop.eup %1067  ;;  %v502_v18 = vadd.f32 1.0, %v1066_v10  ;;  %v505_v19 = vmul.f32 -0.5, %v1066_v10  ;;  %v508_v28 = vand.u32 2147483647, %v1066_v10 }
  0x64   : > { %1083 = vlog2.f32 %v493_v11  ;;  %v511_v20 = vadd.f32 1.0, %v1068_v16  ;;  %v1070_v24 = vpop.eup %1069  ;;  %v514_v29 = vmul.f32 -0.5, %v1068_v16  ;;  %v497_v32 = vadd.f32 1.0, %v496_v17 }
  0x65   : > { %1085 = vlog2.f32 %v502_v18  ;;  %v520_v30 = vadd.f32 1.0, %v1070_v24  ;;  %v1072_v31 = vpop.eup %1071  ;;  %v506_v33 = vadd.f32 1.0, %v505_v19  ;;  %v523_v36 = vmul.f32 -0.5, %v1070_v24 }
  0x66   : > { %1087 = vlog2.f32 %v511_v20  ;;  %v529_v37 = vadd.f32 1.0, %v1072_v31  ;;  %v1074_v39 = vpop.eup %1073  ;;  %vm1611_vm0 = vcmp.lt.f32.partialorder %v499_v25, 0.0004427343  ;;  %v517_v41 = vand.u32 2147483647, %v1068_v16 }
  0x67   : > { %1089 = vlog2.f32 %v520_v30  ;;  %v532_v42 = vmul.f32 -0.5, %v1072_v31  ;;  %v1076_v44 = vpop.eup %1075  ;;  %vm1617_vm1 = vcmp.lt.f32.partialorder %v508_v28, 0.0004427343  ;;  %v515_v46 = vadd.f32 1.0, %v514_v29 }
  0x68   : > { %1091 = vlog2.f32 %v529_v37  ;;  %v538_v47 = vadd.f32 1.0, %v1074_v39  ;;  %v541_v48 = vmul.f32 -0.5, %v1074_v39  ;;  %v498_v49 = vmul.f32 %v1064_v6, %v497_v32 }
  0x69   : > { %v507_v50 = vmul.f32 %v1066_v10, %v506_v33  ;;  %v526_v51 = vand.u32 2147483647, %v1070_v24  ;;  %v547_v52 = vadd.f32 1.0, %v1076_v44  ;;  %v1078_v53 = vpop.eup %1077  ;;  %v524_v54 = vadd.f32 1.0, %v523_v36 }
  0x6a   : > { %v535_v55 = vand.u32 2147483647, %v1072_v31  ;;  %1093 = vlog2.f32 %v538_v47  ;;  %v550_v56 = vmul.f32 -0.5, %v1076_v44  ;;  %vm1621_vm2 = vcmp.lt.f32.partialorder %v517_v41, 0.0004427343 }
  0x6b   : > { %v533_v61 = vadd.f32 1.0, %v532_v42  ;;  %1095 = vlog2.f32 %v547_v52  ;;  %v556_v63 = vadd.f32 1.0, %v1078_v53  ;;  %v1625_v0 = vpop.eup %1079  ;;  %v516_v1 = vmul.f32 %v1068_v16, %v515_v46 }
  0x6c   : > { %v542_v3 = vadd.f32 1.0, %v541_v48  ;;  %v544_v4 = vand.u32 2147483647, %v1074_v39  ;;  %v553_v5 = vand.u32 2147483647, %v1076_v44  ;;  %v551_v6 = vadd.f32 1.0, %v550_v56 }
  0x6d   : > { %1097 = vlog2.f32 %v556_v63  ;;  %v559_v9 = vmul.f32 -0.5, %v1078_v53  ;;  %v565_v10 = vadd.f32 1.0, %v1625_v0  ;;  %v1628_v11 = vpop.eup %1081  ;;  %v525_v13 = vmul.f32 %v1070_v24, %v524_v54  ;;  %v1681_v63 = vld [vmem:[%s1501_s3 + $0x68] sm:$0xff] }
  0x6e   : > { %vm1630_vm3 = vcmp.lt.f32.partialorder %v526_v51, 0.0004427343  ;;  %vm1634_vm4 = vcmp.lt.f32.partialorder %v535_v55, 0.0004427343  ;;  %v562_v16 = vand.u32 2147483647, %v1078_v53  ;;  %v534_v18 = vmul.f32 %v1072_v31, %v533_v61 }
  0x6f   : > { %1099 = vlog2.f32 %v565_v10  ;;  %v568_v19 = vmul.f32 -0.5, %v1625_v0  ;;  %v574_v20 = vadd.f32 1.0, %v1628_v11  ;;  %v543_v24 = vmul.f32 %v1074_v39, %v542_v3  ;;  %v1656_v39 = vld [vmem:[%s1501_s3 + $0x60] sm:$0xff] }
  0x70   : > { %vm1640_vm5 = vcmp.lt.f32.partialorder %v544_v4, 0.0004427343  ;;  %vm1644_vm6 = vcmp.lt.f32.partialorder %v553_v5, 0.0004427343  ;;  %v552_v30 = vmul.f32 %v1076_v44, %v551_v6  ;;  %v560_v31 = vadd.f32 1.0, %v559_v9 }
  0x71   : > { %v1084_v17 = vpop.eup %1083  ;;  %1101 = vlog2.f32 %v574_v20  ;;  %vm1650_vm7 = vcmp.lt.f32.partialorder %v562_v16, 0.0004427343  ;;  %v571_v37 = vand.u32 2147483647, %v1625_v0  ;;  %v569_v46 = vadd.f32 1.0, %v568_v19 }
  0x72   : > { %v1086_v22 = vpop.eup %1085  ;;  %v495_v25 = vmul.f32 0.6931472, %v1084_v17  ;;  %1103 = vpow2.f32 %v449_v38  ;;  %v577_v40 = vmul.f32 -0.5, %v1628_v11  ;;  %v408_v38 = vsub.f32 0.0, %v376_v35 }
  0x73   : > { %v1088_v28 = vpop.eup %1087  ;;  %v504_v29 = vmul.f32 0.6931472, %v1086_v22  ;;  %v561_v45 = vmul.f32 %v1078_v53, %v560_v31  ;;  %vm1676_vm8 = vcmp.lt.f32.partialorder %v571_v37, 0.0004427343  ;;  %v570_v16 = vmul.f32 %v1625_v0, %v569_v46  ;;  %v1720_v46 = vld [vmem:[%s1501_s3 + $0x78] sm:$0xff] }
  0x74   : > { %v501_v32 = vsel %vm1611_vm0, %v498_v49, %v495_v25  ;;  %v513_v33 = vmul.f32 0.6931472, %v1088_v28  ;;  %v1090_v41 = vpop.eup %1089  ;;  %v451_v56 = vmul.f32 1.442695, %v408_v38  ;;  %v578_v5 = vadd.f32 1.0, %v577_v40  ;;  %v1727_v38 = vld [vmem:[%s1501_s3 + $0x80] sm:$0xff] }
  0x75   : > { %v781_v42 = vadd.f32 %v501_v32, %v1578_v58  ;;  %v510_v44 = vsel %vm1617_vm1, %v507_v50, %v504_v29  ;;  %v522_v49 = vmul.f32 0.6931472, %v1090_v41  ;;  %v1092_v51 = vpop.eup %1091  ;;  %v377_v50 = vand.u32 2147483647, %v1656_v39 }
  0x76   : > { %v782_v47 = vadd.f32 %v510_v44, %v1580_v59  ;;  %v519_v48 = vsel %vm1621_vm2, %v516_v1, %v513_v33  ;;  %v531_v59 = vmul.f32 0.6931472, %v1092_v51  ;;  %1105 = vpow2.f32 %v451_v56 }
  0x77   : > { %v813_v52 = vsub.f32 0.0, %v781_v42  ;;  %v783_v58 = vadd.f32 %v519_v48, %v1584_v62  ;;  %v528_v55 = vsel %vm1630_vm3, %v525_v13, %v522_v49  ;;  %v1094_v60 = vpop.eup %1093  ;;  %v409_v53 = vsub.f32 0.0, %v377_v50  ;;  %v250_v62 = vld [vmem:[%s1509_s5 + $0x68] sm:$0xff] }
  0x78   : > { %v814_v54 = vsub.f32 0.0, %v782_v47  ;;  %v784_v61 = vadd.f32 %v528_v55, %v1587_v2  ;;  %v1096_v1 = vpop.eup %1095  ;;  %v537_v3 = vsel %vm1634_vm4, %v534_v18, %v531_v59  ;;  %v540_v4 = vmul.f32 0.6931472, %v1094_v60  ;;  %v1694_v18 = vld [vmem:[%s1501_s3 + $0x70] sm:$0xff]  ;;  %v249_v55 = vld [vmem:[%s1509_s5 + $0x60] sm:$0xff] }
  0x79   : > { %845 = vst [vmem:[%s1672_s20] sm:$0xff] %v813_v52  ;;  %v815_v35 = vsub.f32 0.0, %v783_v58  ;;  %v785_v2 = vadd.f32 %v537_v3, %v1592_v7  ;;  %v549_v9 = vmul.f32 0.6931472, %v1096_v1  ;;  %v453_v10 = vmul.f32 1.442695, %v409_v53  ;;  %v248_v58 = vld [vmem:[%s1509_s5 + $0x58] sm:$0xff] }
  0x7a   : > { %846 = vst [vmem:[%s1672_s20 + $0x8] sm:$0xff] %v814_v54  ;;  %v816_v6 = vsub.f32 0.0, %v784_v61  ;;  %v1098_v13 = vpop.eup %1097  ;;  %v546_v14 = vsel %vm1640_vm5, %v543_v24, %v540_v4  ;;  %v580_v15 = vand.u32 2147483647, %v1628_v11  ;;  %v378_v17 = vand.u32 2147483647, %v1681_v63 }
  0x7b   : > { %847 = vst [vmem:[%s1672_s20 + $0x10] sm:$0xff] %v815_v35  ;;  %v817_v19 = vsub.f32 0.0, %v785_v2  ;;  %v786_v20 = vadd.f32 %v546_v14, %v1594_v8  ;;  %v555_v7 = vsel %vm1644_vm6, %v552_v30, %v549_v9  ;;  %v558_v22 = vmul.f32 0.6931472, %v1098_v13  ;;  %v251_v1 = vld [vmem:[%s1509_s5 + $0x70] sm:$0xff] }
  0x7c   : > { %848 = vst [vmem:[%s1672_s20 + $0x18] sm:$0xff] %v816_v6  ;;  %v1100_v25 = vpop.eup %1099  ;;  %v787_v24 = vadd.f32 %v555_v7, %v1596_v12  ;;  %v579_v0 = vmul.f32 %v1628_v11, %v578_v5  ;;  %1107 = vpow2.f32 %v453_v10  ;;  %v410_v26 = vsub.f32 0.0, %v378_v17  ;;  %v1754_v9 = vld [vmem:[%s1501_s3 + $0x90] sm:$0xff]  ;;  %v252_v12 = vld [vmem:[%s1509_s5 + $0x78] sm:$0xff] }
  0x7d   : > { %849 = vst [vmem:[%s1672_s20 + $0x20] sm:$0xff] %v817_v19  ;;  %v818_v28 = vsub.f32 0.0, %v786_v20  ;;  %v564_v29 = vsel %vm1650_vm7, %v561_v45, %v558_v22  ;;  %v567_v31 = vmul.f32 0.6931472, %v1100_v25  ;;  %v379_v8 = vand.u32 2147483647, %v1694_v18 }
  0x7e   : > { %v1102_v27 = vpop.eup %1101  ;;  %v819_v30 = vsub.f32 0.0, %v787_v24  ;;  %v788_v32 = vadd.f32 %v564_v29, %v1601_v21  ;;  %vm1707_vm9 = vcmp.lt.f32.partialorder %v580_v15, 0.0004427343  ;;  %v455_v11 = vmul.f32 1.442695, %v410_v26  ;;  %v1734_v45 = vld [vmem:[%s1501_s3 + $0x88] sm:$0xff] }
  0x7f   : > { %v1711_v33 = vpop.eup %1103  ;;  %850 = vst [vmem:[%s1672_s20 + $0x28] sm:$0xff] %v818_v28  ;;  %v573_v36 = vsel %vm1676_vm8, %v570_v16, %v567_v31  ;;  %v576_v37 = vmul.f32 0.6931472, %v1102_v27  ;;  %v411_v41 = vsub.f32 0.0, %v379_v8  ;;  %v380_v51 = vand.u32 2147483647, %v1720_v46 }
  0x80   : > { %851 = vst [vmem:[%s1672_s20 + $0x30] sm:$0xff] %v819_v30  ;;  %v820_v42 = vsub.f32 0.0, %v788_v32  ;;  %v789_v21 = vadd.f32 %v573_v36, %v1608_v34  ;;  %v583_v44 = vadd.f32 1.0, %v1711_v33  ;;  %1109 = vpow2.f32 %v455_v11  ;;  %v247_v34 = vld [vmem:[%s1509_s5 + $0x50] sm:$0xff]  ;;  %v1763_v20 = vld [vmem:[%s1501_s3 + $0x98] sm:$0xff] }
  0x81   : > { %v582_v40 = vsel %vm1707_vm9, %v579_v0, %v576_v37  ;;  %v457_v47 = vmul.f32 1.442695, %v411_v41  ;;  %v279_v54 = vmax.f32 %v1576_v57, 0.0  ;;  %v381_v59 = vand.u32 2147483647, %v1727_v38 }
  0x82   : > { %852 = vst [vmem:[%s1672_s20 + $0x38] sm:$0xff] %v820_v42  ;;  %v821_v48 = vsub.f32 0.0, %v789_v21  ;;  %v790_v49 = vadd.f32 %v582_v40, %v1615_v43  ;;  %1111 = vlog2.f32 %v583_v44  ;;  %v412_v43 = vsub.f32 0.0, %v380_v51  ;;  %v253_v42 = vld [vmem:[%s1509_s5 + $0x80] sm:$0xff] }
  0x83   : > { %1113 = vpow2.f32 %v457_v47  ;;  %v1736_v50 = vpop.eup %1105  ;;  %v311_v56 = vmul.f32 %v247_v34, %v1576_v57  ;;  %v586_v60 = vmul.f32 -0.5, %v1711_v33  ;;  %v280_v35 = vmax.f32 %v1604_v23, 0.0 }
  0x84   : > { %853 = vst [vmem:[%s1672_s20 + $0x40] sm:$0xff] %v821_v48  ;;  %v822_v52 = vsub.f32 0.0, %v790_v49  ;;  %v592_v61 = vadd.f32 1.0, %v1736_v50  ;;  %v312_v53 = vmul.f32 %v248_v58, %v1604_v23  ;;  %v459_v3 = vmul.f32 1.442695, %v412_v43  ;;  %v1792_v48 = vld [vmem:[%s1501_s3 + $0xa0] sm:$0xff] }
  0x85   : > { %v413_v4 = vsub.f32 0.0, %v381_v59  ;;  %v382_v5 = vand.u32 2147483647, %v1734_v45  ;;  %v281_v6 = vmax.f32 %v1656_v39, 0.0  ;;  %v313_v57 = vmul.f32 %v249_v55, %v1656_v39  ;;  %v1800_v55 = vld [vmem:[%s1501_s3 + $0xa8] sm:$0xff] }
  0x86   : > { %854 = vst [vmem:[%s1672_s20 + $0x48] sm:$0xff] %v822_v52  ;;  %1115 = vlog2.f32 %v592_v61  ;;  %v282_v2 = vmax.f32 %v1681_v63, 0.0  ;;  %v314_v13 = vmul.f32 %v250_v62, %v1681_v63  ;;  %v587_v16 = vadd.f32 1.0, %v586_v60 }
  0x87   : > { %1117 = vpow2.f32 %v459_v3  ;;  %v461_v23 = vmul.f32 1.442695, %v413_v4  ;;  %v414_v14 = vsub.f32 0.0, %v382_v5  ;;  %v283_v17 = vmax.f32 %v1694_v18, 0.0 }
  0x88   : > { %v315_v19 = vmul.f32 %v251_v1, %v1694_v18  ;;  %v589_v39 = vand.u32 2147483647, %v1711_v33  ;;  %v383_v22 = vand.u32 2147483647, %v1754_v9  ;;  %v595_v63 = vmul.f32 -0.5, %v1736_v50 }
  0x89   : > { %v1756_v10 = vpop.eup %1107  ;;  %1119 = vpow2.f32 %v461_v23  ;;  %v463_v7 = vmul.f32 1.442695, %v414_v14  ;;  %v343_v25 = vsub.f32 %v279_v54, %v311_v56  ;;  %v344_v24 = vsub.f32 %v280_v35, %v312_v53 }
  0x8a   : > { %v601_v15 = vadd.f32 1.0, %v1756_v10  ;;  %v415_v0 = vsub.f32 0.0, %v383_v22  ;;  %v588_v18 = vmul.f32 %v1711_v33, %v587_v16  ;;  %v1771_v28 = vsub.f32 %v281_v6, %v313_v57 }
  0x8b   : > { %v1773_v29 = vsub.f32 %v282_v2, %v314_v13  ;;  %v384_v31 = vand.u32 2147483647, %v1763_v20  ;;  %vm1776_vm10 = vcmp.lt.f32.partialorder %v589_v39, 0.0004427343  ;;  %v1781_v32 = vsub.f32 %v283_v17, %v315_v19 }
  0x8c   : > { %1121 = vlog2.f32 %v601_v15  ;;  %v465_v11 = vmul.f32 1.442695, %v415_v0  ;;  %v596_v37 = vadd.f32 1.0, %v595_v63  ;;  %v604_v41 = vmul.f32 -0.5, %v1756_v10 }
  0x8d   : > { %1123 = vpow2.f32 %v463_v7  ;;  %v1768_v26 = vpop.eup %1109  ;;  %v416_v21 = vsub.f32 0.0, %v384_v31  ;;  %v598_v44 = vand.u32 2147483647, %v1736_v50  ;;  %v284_v47 = vmax.f32 %v1720_v46, 0.0 }
  0x8e   : > { %v610_v30 = vadd.f32 1.0, %v1768_v26  ;;  %v316_v34 = vmul.f32 %v252_v12, %v1720_v46  ;;  %v285_v51 = vmax.f32 %v1727_v38, 0.0  ;;  %v317_v58 = vmul.f32 %v253_v42, %v1727_v38  ;;  %v254_v38 = vld [vmem:[%s1509_s5 + $0x88] sm:$0xff] }
  0x8f   : > { %v1112_v8 = vpop.eup %1111  ;;  %v467_v54 = vmul.f32 1.442695, %v416_v21  ;;  %v597_v43 = vmul.f32 %v1736_v50, %v596_v37  ;;  %v605_v59 = vadd.f32 1.0, %v604_v41  ;;  %v607_v56 = vand.u32 2147483647, %v1756_v10  ;;  %v1848_v37 = vld [vmem:[%s1501_s3 + $0xb0] sm:$0xff] }
  0x90   : > { %v1784_v36 = vpop.eup %1113  ;;  %v585_v33 = vmul.f32 0.6931472, %v1112_v8  ;;  %1125 = vlog2.f32 %v610_v30  ;;  %v385_v60 = vand.u32 2147483647, %v1792_v48  ;;  %vm1805_vm11 = vcmp.lt.f32.partialorder %v598_v44, 0.0004427343 }
  0x91   : > { %v619_v40 = vadd.f32 1.0, %v1784_v36  ;;  %1127 = vpow2.f32 %v465_v11  ;;  %v613_v62 = vmul.f32 -0.5, %v1768_v26  ;;  %v1813_v3 = vsub.f32 %v284_v47, %v316_v34  ;;  %v255_v34 = vld [vmem:[%s1509_s5 + $0x90] sm:$0xff] }
  0x92   : > { %v591_v49 = vsel %vm1776_vm10, %v588_v18, %v585_v33  ;;  %v417_v50 = vsub.f32 0.0, %v385_v60  ;;  %v386_v4 = vand.u32 2147483647, %v1800_v55  ;;  %v622_v5 = vmul.f32 -0.5, %v1784_v36 }
  0x93   : > { %v791_v52 = vadd.f32 %v591_v49, %v343_v25  ;;  %1129 = vlog2.f32 %v619_v40  ;;  %v1116_v46 = vpop.eup %1115  ;;  %v1819_v57 = vsub.f32 %v285_v51, %v317_v58  ;;  %v286_v2 = vmax.f32 %v1734_v45, 0.0 }
  0x94   : > { %1131 = vpow2.f32 %v467_v54  ;;  %v1811_v53 = vpop.eup %1117  ;;  %v594_v1 = vmul.f32 0.6931472, %v1116_v46  ;;  %v606_v14 = vmul.f32 %v1756_v10, %v605_v59  ;;  %vm1827_vm12 = vcmp.lt.f32.partialorder %v607_v56, 0.0004427343 }
  0x95   : > { %v823_v35 = vsub.f32 0.0, %v791_v52  ;;  %v628_v6 = vadd.f32 1.0, %v1811_v53  ;;  %v318_v15 = vmul.f32 %v254_v38, %v1734_v45  ;;  %v614_v39 = vadd.f32 1.0, %v613_v62 }
  0x96   : > { %v1822_v13 = vpop.eup %1119  ;;  %v600_v23 = vsel %vm1805_vm11, %v597_v43, %v594_v1  ;;  %v616_v7 = vand.u32 2147483647, %v1768_v26  ;;  %v469_v10 = vmul.f32 1.442695, %v417_v50  ;;  %v418_v0 = vsub.f32 0.0, %v386_v4 }
  0x97   : > { %855 = vst [vmem:[%s1672_s20 + $0x50] sm:$0xff] %v823_v35  ;;  %v792_v19 = vadd.f32 %v600_v23, %v344_v24  ;;  %1133 = vlog2.f32 %v628_v6  ;;  %v637_v25 = vadd.f32 1.0, %v1822_v13  ;;  %v623_v31 = vadd.f32 1.0, %v622_v5 }
  0x98   : > { %v625_v8 = vand.u32 2147483647, %v1784_v36  ;;  %v631_v27 = vmul.f32 -0.5, %v1811_v53  ;;  %v287_v30 = vmax.f32 %v1754_v9, 0.0  ;;  %v615_v11 = vmul.f32 %v1768_v26, %v614_v39 }
  0x99   : > { %v1122_v17 = vpop.eup %1121  ;;  %v824_v18 = vsub.f32 0.0, %v792_v19  ;;  %1135 = vlog2.f32 %v637_v25  ;;  %v1845_v33 = vsub.f32 %v286_v2, %v318_v15  ;;  %vm1850_vm13 = vcmp.lt.f32.partialorder %v616_v7, 0.0004427343  ;;  %v256_v2 = vld [vmem:[%s1509_s5 + $0x98] sm:$0xff] }
  0x9a   : > { %v1833_v22 = vpop.eup %1123  ;;  %v603_v63 = vmul.f32 0.6931472, %v1122_v17  ;;  %v634_v21 = vand.u32 2147483647, %v1811_v53  ;;  %v471_v44 = vmul.f32 1.442695, %v418_v0  ;;  %v624_v26 = vmul.f32 %v1784_v36, %v623_v31 }
  0x9b   : > { %v646_v45 = vadd.f32 1.0, %v1833_v22  ;;  %856 = vst [vmem:[%s1672_s20 + $0x58] sm:$0xff] %v824_v18  ;;  %vm1858_vm14 = vcmp.lt.f32.partialorder %v625_v8, 0.0004427343  ;;  %v632_v52 = vadd.f32 1.0, %v631_v27  ;;  %v640_v58 = vmul.f32 -0.5, %v1822_v13 }
  0x9c   : > { %v609_v24 = vsel %vm1827_vm12, %v606_v14, %v603_v63  ;;  %v649_v36 = vmul.f32 -0.5, %v1833_v22  ;;  %v387_v56 = vand.u32 2147483647, %v1848_v37  ;;  %vm1873_vm15 = vcmp.lt.f32.partialorder %v634_v21, 0.0004427343  ;;  %v1893_v17 = vld [vmem:[%s1501_s3 + $0xc0] sm:$0xff] }
  0x9d   : > { %v793_v12 = vadd.f32 %v609_v24, %v1771_v28  ;;  %1137 = vlog2.f32 %v646_v45  ;;  %v1126_v41 = vpop.eup %1125  ;;  %v1878_v61 = vmul.f32 %v255_v34, %v1754_v9  ;;  %v643_v38 = vand.u32 2147483647, %v1822_v13  ;;  %v1904_v18 = vld [vmem:[%s1501_s3 + $0xc8] sm:$0xff] }
  0x9e   : > { %1139 = vpow2.f32 %v469_v10  ;;  %v1855_v40 = vpop.eup %1127  ;;  %v612_v47 = vmul.f32 0.6931472, %v1126_v41  ;;  %v641_v6 = vadd.f32 1.0, %v640_v58  ;;  %v419_v23 = vsub.f32 0.0, %v387_v56  ;;  %v258_v10 = vld [vmem:[%s1509_s5 + $0xa8] sm:$0xff] }
  0x9f   : > { %v825_v28 = vsub.f32 0.0, %v793_v12  ;;  %v655_v54 = vadd.f32 1.0, %v1855_v40  ;;  %1141 = vpow2.f32 %v471_v44  ;;  %v658_v1 = vmul.f32 -0.5, %v1855_v40 }
  0xa0   : > { %v1130_v51 = vpop.eup %1129  ;;  %v618_v43 = vsel %vm1850_vm13, %v615_v11, %v612_v47  ;;  %v633_v14 = vmul.f32 %v1811_v53, %v632_v52  ;;  %v650_v16 = vadd.f32 1.0, %v649_v36  ;;  %v652_v15 = vand.u32 2147483647, %v1833_v22 }
  0xa1   : > { %857 = vst [vmem:[%s1672_s20 + $0x60] sm:$0xff] %v825_v28  ;;  %v621_v59 = vmul.f32 0.6931472, %v1130_v51  ;;  %v1870_v60 = vpop.eup %1131  ;;  %v794_v46 = vadd.f32 %v618_v43, %v1773_v29  ;;  %1143 = vlog2.f32 %v655_v54  ;;  %v1886_v29 = vld [vmem:[%s1501_s3 + $0xb8] sm:$0xff]  ;;  %v288_v7 = vmax.f32 %v1763_v20, 0.0 }
  0xa2   : > { %v664_v50 = vadd.f32 1.0, %v1870_v60  ;;  %v473_v63 = vmul.f32 1.442695, %v419_v23  ;;  %vm1898_vm0 = vcmp.lt.f32.partialorder %v643_v38, 0.0004427343  ;;  %v659_v53 = vadd.f32 1.0, %v658_v1 }
  0xa3   : > { %v627_v62 = vsel %vm1858_vm14, %v624_v26, %v621_v59  ;;  %v826_v4 = vsub.f32 0.0, %v794_v46  ;;  %v320_v0 = vmul.f32 %v256_v2, %v1763_v20  ;;  %v642_v31 = vmul.f32 %v1822_v13, %v641_v6  ;;  %v1943_v38 = vld [vmem:[%s1501_s3 + $0xd0] sm:$0xff] }
  0xa4   : > { %v795_v5 = vadd.f32 %v627_v62, %v1781_v32  ;;  %1145 = vlog2.f32 %v664_v50  ;;  %v1134_v19 = vpop.eup %1133  ;;  %v388_v32 = vand.u32 2147483647, %v1886_v29  ;;  %v667_v8 = vmul.f32 -0.5, %v1870_v60 }
  0xa5   : > { %858 = vst [vmem:[%s1672_s20 + $0x68] sm:$0xff] %v826_v4  ;;  %v630_v25 = vmul.f32 0.6931472, %v1134_v19  ;;  %1147 = vpow2.f32 %v473_v63  ;;  %v651_v12 = vmul.f32 %v1833_v22, %v650_v16  ;;  %vm1912_vm1 = vcmp.lt.f32.partialorder %v652_v15, 0.0004427343  ;;  %v257_v15 = vld [vmem:[%s1509_s5 + $0xa0] sm:$0xff] }
  0xa6   : > { %v827_v39 = vsub.f32 0.0, %v795_v5  ;;  %v420_v45 = vsub.f32 0.0, %v388_v32  ;;  %v1136_v24 = vpop.eup %1135  ;;  %v389_v20 = vand.u32 2147483647, %v1893_v17  ;;  %v390_v44 = vand.u32 2147483647, %v1904_v18 }
  0xa7   : > { %v636_v27 = vsel %vm1873_vm15, %v633_v14, %v630_v25  ;;  %v639_v13 = vmul.f32 0.6931472, %v1136_v24  ;;  %v660_v26 = vmul.f32 %v1855_v40, %v659_v53  ;;  %v661_v22 = vand.u32 2147483647, %v1855_v40  ;;  %v1957_v14 = vld [vmem:[%s1501_s3 + $0xd8] sm:$0xff]  ;;  %v1971_v24 = vld [vmem:[%s1501_s3 + $0xe0] sm:$0xff] }
  0xa8   : > { %859 = vst [vmem:[%s1672_s20 + $0x70] sm:$0xff] %v827_v39  ;;  %v796_v42 = vadd.f32 %v636_v27, %v1813_v3  ;;  %v475_v21 = vmul.f32 1.442695, %v420_v45  ;;  %v670_v49 = vand.u32 2147483647, %v1870_v60  ;;  %v668_v52 = vadd.f32 1.0, %v667_v8 }
  0xa9   : > { %v645_v51 = vsel %vm1898_vm0, %v642_v31, %v639_v13  ;;  %v421_v40 = vsub.f32 0.0, %v389_v20  ;;  %v422_v56 = vsub.f32 0.0, %v390_v44  ;;  %vm1938_vm2 = vcmp.lt.f32.partialorder %v661_v22, 0.0004427343  ;;  %v1974_v27 = vld [vmem:[%s1501_s3 + $0xe8] sm:$0xff] }
  0xaa   : > { %v1138_v41 = vpop.eup %1137  ;;  %v828_v34 = vsub.f32 0.0, %v796_v42  ;;  %v797_v54 = vadd.f32 %v645_v51, %v1819_v57  ;;  %1149 = vpow2.f32 %v475_v21  ;;  %v351_v57 = vsub.f32 %v287_v30, %v1878_v61 }
  0xab   : > { %v1919_v28 = vpop.eup %1139  ;;  %v648_v47 = vmul.f32 0.6931472, %v1138_v41  ;;  %v352_v50 = vsub.f32 %v288_v7, %v320_v0  ;;  %v669_v4 = vmul.f32 %v1870_v60, %v668_v52  ;;  %vm1947_vm3 = vcmp.lt.f32.partialorder %v670_v49, 0.0004427343 }
  0xac   : > { %v673_v3 = vadd.f32 1.0, %v1919_v28  ;;  %v1927_v58 = vpop.eup %1141  ;;  %860 = vst [vmem:[%s1672_s20 + $0x78] sm:$0xff] %v828_v34  ;;  %v829_v35 = vsub.f32 0.0, %v797_v54  ;;  %v477_v9 = vmul.f32 1.442695, %v421_v40  ;;  %v676_v6 = vmul.f32 -0.5, %v1919_v28 }
  0xad   : > { %v654_v43 = vsel %vm1912_vm1, %v651_v12, %v648_v47  ;;  %v682_v36 = vadd.f32 1.0, %v1927_v58  ;;  %v479_v2 = vmul.f32 1.442695, %v422_v56  ;;  %v391_v23 = vand.u32 2147483647, %v1943_v38  ;;  %v259_v40 = vld [vmem:[%s1509_s5 + $0xb0] sm:$0xff] }
  0xae   : > { %v798_v59 = vadd.f32 %v654_v43, %v1845_v33  ;;  %1151 = vlog2.f32 %v673_v3  ;;  %v1144_v46 = vpop.eup %1143  ;;  %861 = vst [vmem:[%s1672_s20 + $0x80] sm:$0xff] %v829_v35  ;;  %v685_v19 = vmul.f32 -0.5, %v1927_v58  ;;  %v289_v25 = vmax.f32 %v1792_v48, 0.0 }
  0xaf   : > { %v657_v33 = vmul.f32 0.6931472, %v1144_v46  ;;  %1153 = vlog2.f32 %v682_v36  ;;  %v423_v39 = vsub.f32 0.0, %v391_v23  ;;  %v392_v53 = vand.u32 2147483647, %v1957_v14 }
  0xb0   : > { %v830_v1 = vsub.f32 0.0, %v798_v59  ;;  %1155 = vpow2.f32 %v477_v9  ;;  %v321_v31 = vmul.f32 %v257_v15, %v1792_v48  ;;  %v677_v8 = vadd.f32 1.0, %v676_v6 }
  0xb1   : > { %v1146_v30 = vpop.eup %1145  ;;  %v663_v61 = vsel %vm1938_vm2, %v660_v26, %v657_v33  ;;  %1157 = vpow2.f32 %v479_v2  ;;  %v679_v12 = vand.u32 2147483647, %v1919_v28  ;;  %v290_v11 = vmax.f32 %v1800_v55, 0.0  ;;  %v2003_v33 = vld [vmem:[%s1501_s3 + $0xf0] sm:$0xff] }
  0xb2   : > { %862 = vst [vmem:[%s1672_s20 + $0x88] sm:$0xff] %v830_v1  ;;  %v799_v16 = vadd.f32 %v663_v61, %v351_v57  ;;  %v666_v60 = vmul.f32 0.6931472, %v1146_v30  ;;  %v1961_v7 = vpop.eup %1147  ;;  %v481_v20 = vmul.f32 1.442695, %v423_v39  ;;  %v424_v41 = vsub.f32 0.0, %v392_v53 }
  0xb3   : > { %v691_v45 = vadd.f32 1.0, %v1961_v7  ;;  %v322_v13 = vmul.f32 %v258_v10, %v1800_v55  ;;  %v686_v21 = vadd.f32 1.0, %v685_v19  ;;  %v688_v48 = vand.u32 2147483647, %v1927_v58 }
  0xb4   : > { %v831_v63 = vsub.f32 0.0, %v799_v16  ;;  %v672_v32 = vsel %vm1947_vm3, %v669_v4, %v666_v60  ;;  %v483_v44 = vmul.f32 1.442695, %v424_v41  ;;  %v393_v47 = vand.u32 2147483647, %v1971_v24  ;;  %v260_v60 = vld [vmem:[%s1509_s5 + $0xb8] sm:$0xff] }
  0xb5   : > { %v800_v0 = vadd.f32 %v672_v32, %v352_v50  ;;  %1159 = vlog2.f32 %v691_v45  ;;  %v353_v22 = vsub.f32 %v289_v25, %v321_v31  ;;  %v678_v49 = vmul.f32 %v1919_v28, %v677_v8  ;;  %v2020_v32 = vld [vmem:[%s1501_s3 + $0xf8] sm:$0xff]  ;;  %v261_v45 = vld [vmem:[%s1509_s5 + $0xc0] sm:$0xff] }
  0xb6   : > { %863 = vst [vmem:[%s1672_s20 + $0x90] sm:$0xff] %v831_v63  ;;  %1161 = vpow2.f32 %v481_v20  ;;  %v394_v34 = vand.u32 2147483647, %v1974_v27  ;;  %vm1987_vm4 = vcmp.lt.f32.partialorder %v679_v12, 0.0004427343  ;;  %v694_v52 = vmul.f32 -0.5, %v1961_v7 }
  0xb7   : > { %v832_v42 = vsub.f32 0.0, %v800_v0  ;;  %v1982_v26 = vpop.eup %1149  ;;  %1163 = vpow2.f32 %v483_v44  ;;  %v687_v43 = vmul.f32 %v1927_v58, %v686_v21  ;;  %v425_v59 = vsub.f32 0.0, %v393_v47 }
  0xb8   : > { %v700_v3 = vadd.f32 1.0, %v1982_v26  ;;  %v426_v36 = vsub.f32 0.0, %v394_v34  ;;  %v354_v56 = vsub.f32 %v290_v11, %v322_v13  ;;  %vm1995_vm5 = vcmp.lt.f32.partialorder %v688_v48, 0.0004427343 }
  0xb9   : > { %864 = vst [vmem:[%s1672_s20 + $0x98] sm:$0xff] %v832_v42  ;;  %v291_v62 = vmax.f32 %v1848_v37, 0.0  ;;  %v485_v1 = vmul.f32 1.442695, %v425_v59  ;;  %v323_v50 = vmul.f32 %v259_v40, %v1848_v37  ;;  %v695_v4 = vadd.f32 1.0, %v694_v52  ;;  %v262_v52 = vld [vmem:[%s1509_s5 + $0xc8] sm:$0xff] }
  0xba   : > { %1165 = vlog2.f32 %v700_v3  ;;  %v697_v5 = vand.u32 2147483647, %v1961_v7  ;;  %v703_v61 = vmul.f32 -0.5, %v1982_v26  ;;  %v487_v6 = vmul.f32 1.442695, %v426_v36 }
  0xbb   : > { %v1152_v51 = vpop.eup %1151  ;;  %1167 = vpow2.f32 %v485_v1  ;;  %v395_v15 = vand.u32 2147483647, %v2003_v33  ;;  %v355_v63 = vsub.f32 %v291_v62, %v323_v50  ;;  %v696_v25 = vmul.f32 %v1961_v7, %v695_v4 }
  0xbc   : > { %v675_v54 = vmul.f32 0.6931472, %v1152_v51  ;;  %v1154_v28 = vpop.eup %1153  ;;  %v292_v10 = vmax.f32 %v1886_v29, 0.0  ;;  %v324_v53 = vmul.f32 %v260_v60, %v1886_v29  ;;  %vm2026_vm6 = vcmp.lt.f32.partialorder %v697_v5, 0.0004427343 }
  0xbd   : > { %v684_v57 = vmul.f32 0.6931472, %v1154_v28  ;;  %v2007_v9 = vpop.eup %1155  ;;  %v704_v8 = vadd.f32 1.0, %v703_v61  ;;  %v427_v12 = vsub.f32 0.0, %v395_v15  ;;  %v706_v7 = vand.u32 2147483647, %v1982_v26 }
  0xbe   : > { %v681_v35 = vsel %vm1987_vm4, %v678_v49, %v675_v54  ;;  %v2012_v2 = vpop.eup %1157  ;;  %v709_v37 = vadd.f32 1.0, %v2007_v9  ;;  %v396_v41 = vand.u32 2147483647, %v2020_v32  ;;  %v293_v29 = vmax.f32 %v1893_v17, 0.0 }
  0xbf   : > { %v801_v58 = vadd.f32 %v681_v35, %v353_v22  ;;  %v690_v30 = vsel %vm1995_vm5, %v687_v43, %v684_v57  ;;  %v718_v19 = vadd.f32 1.0, %v2012_v2  ;;  %v712_v42 = vmul.f32 -0.5, %v2007_v9 }
  0xc0   : > { %v802_v16 = vadd.f32 %v690_v30, %v354_v56  ;;  %1169 = vlog2.f32 %v709_v37  ;;  %v489_v21 = vmul.f32 1.442695, %v427_v12  ;;  %v356_v47 = vsub.f32 %v292_v10, %v324_v53  ;;  %v263_v30 = vld [vmem:[%s1509_s5 + $0xd0] sm:$0xff] }
  0xc1   : > { %v833_v23 = vsub.f32 0.0, %v801_v58  ;;  %1171 = vlog2.f32 %v718_v19  ;;  %v721_v22 = vmul.f32 -0.5, %v2012_v2  ;;  %v428_v49 = vsub.f32 0.0, %v396_v41  ;;  %v265_v41 = vld [vmem:[%s1509_s5 + $0xe0] sm:$0xff] }
  0xc2   : > { %v834_v39 = vsub.f32 0.0, %v802_v16  ;;  %v1160_v0 = vpop.eup %1159  ;;  %1173 = vpow2.f32 %v487_v6  ;;  %v705_v51 = vmul.f32 %v1982_v26, %v704_v8  ;;  %v325_v55 = vmul.f32 %v261_v45, %v1893_v17  ;;  %v264_v16 = vld [vmem:[%s1509_s5 + $0xd8] sm:$0xff] }
  0xc3   : > { %865 = vst [vmem:[%s1672_s20 + $0xa0] sm:$0xff] %v833_v23  ;;  %v2031_v11 = vpop.eup %1161  ;;  %v693_v20 = vmul.f32 0.6931472, %v1160_v0  ;;  %vm2046_vm7 = vcmp.lt.f32.partialorder %v706_v7, 0.0004427343  ;;  %v713_v28 = vadd.f32 1.0, %v712_v42  ;;  %v326_v26 = vmul.f32 %v262_v52, %v1904_v18 }
  0xc4   : > { %866 = vst [vmem:[%s1672_s20 + $0xa8] sm:$0xff] %v834_v39  ;;  %v727_v13 = vadd.f32 1.0, %v2031_v11  ;;  %v2038_v48 = vpop.eup %1163  ;;  %v715_v43 = vand.u32 2147483647, %v2007_v9  ;;  %v491_v56 = vmul.f32 1.442695, %v428_v49  ;;  %v357_v4 = vsub.f32 %v293_v29, %v325_v55 }
  0xc5   : > { %v699_v44 = vsel %vm2026_vm6, %v696_v25, %v693_v20  ;;  %v736_v40 = vadd.f32 1.0, %v2038_v48  ;;  %v294_v17 = vmax.f32 %v1904_v18, 0.0  ;;  %v722_v46 = vadd.f32 1.0, %v721_v22 }
  0xc6   : > { %v803_v34 = vadd.f32 %v699_v44, %v355_v63  ;;  %1175 = vlog2.f32 %v727_v13  ;;  %v724_v62 = vand.u32 2147483647, %v2012_v2  ;;  %v730_v1 = vmul.f32 -0.5, %v2031_v11 }
  0xc7   : > { %v1166_v3 = vpop.eup %1165  ;;  %1177 = vpow2.f32 %v489_v21  ;;  %v714_v18 = vmul.f32 %v2007_v9, %v713_v28  ;;  %vm2063_vm8 = vcmp.lt.f32.partialorder %v715_v43, 0.0004427343  ;;  %v723_v23 = vmul.f32 %v2012_v2, %v722_v46 }
  0xc8   : > { %v835_v59 = vsub.f32 0.0, %v803_v34  ;;  %v702_v36 = vmul.f32 0.6931472, %v1166_v3  ;;  %1179 = vlog2.f32 %v736_v40  ;;  %v2054_v35 = vpop.eup %1167  ;;  %v739_v60 = vmul.f32 -0.5, %v2038_v48 }
  0xc9   : > { %1181 = vpow2.f32 %v491_v56  ;;  %v745_v50 = vadd.f32 1.0, %v2054_v35  ;;  %v358_v19 = vsub.f32 %v294_v17, %v326_v26  ;;  %vm2071_vm9 = vcmp.lt.f32.partialorder %v724_v62, 0.0004427343 }
  0xca   : > { %867 = vst [vmem:[%s1672_s20 + $0xb0] sm:$0xff] %v835_v59  ;;  %v708_v57 = vsel %vm2046_vm7, %v705_v51, %v702_v36  ;;  %v731_v9 = vadd.f32 1.0, %v730_v1  ;;  %v295_v10 = vmax.f32 %v1943_v38, 0.0  ;;  %v327_v2 = vmul.f32 %v263_v30, %v1943_v38 }
  0xcb   : > { %v804_v58 = vadd.f32 %v708_v57, %v356_v47  ;;  %1183 = vlog2.f32 %v745_v50  ;;  %v733_v53 = vand.u32 2147483647, %v2031_v11  ;;  %v296_v31 = vmax.f32 %v1957_v14, 0.0 }
  0xcc   : > { %v328_v8 = vmul.f32 %v264_v16, %v1957_v14  ;;  %v740_v7 = vadd.f32 1.0, %v739_v60  ;;  %v748_v38 = vmul.f32 -0.5, %v2054_v35  ;;  %v732_v42 = vmul.f32 %v2031_v11, %v731_v9 }
  0xcd   : > { %v1170_v61 = vpop.eup %1169  ;;  %v836_v6 = vsub.f32 0.0, %v804_v58  ;;  %v742_v13 = vand.u32 2147483647, %v2038_v48  ;;  %v359_v44 = vsub.f32 %v295_v10, %v327_v2  ;;  %vm2092_vm10 = vcmp.lt.f32.partialorder %v733_v53, 0.0004427343  ;;  %v268_v53 = vld [vmem:[%s1509_s5 + $0xf8] sm:$0xff] }
  0xce   : > { %v1172_v37 = vpop.eup %1171  ;;  %v711_v15 = vmul.f32 0.6931472, %v1170_v61  ;;  %v297_v51 = vmax.f32 %v1971_v24, 0.0  ;;  %v329_v55 = vmul.f32 %v265_v41, %v1971_v24  ;;  %v360_v11 = vsub.f32 %v296_v31, %v328_v8 }
  0xcf   : > { %v2075_v63 = vpop.eup %1173  ;;  %868 = vst [vmem:[%s1672_s20 + $0xb8] sm:$0xff] %v836_v6  ;;  %v720_v25 = vmul.f32 0.6931472, %v1172_v37  ;;  %v741_v52 = vmul.f32 %v2038_v48, %v740_v7  ;;  %v749_v3 = vadd.f32 1.0, %v748_v38  ;;  %vm743_vm11 = vcmp.lt.f32.partialorder %v742_v13, 0.0004427343 }
  0xd0   : > { %v717_v0 = vsel %vm2063_vm8, %v714_v18, %v711_v15  ;;  %v754_v45 = vadd.f32 1.0, %v2075_v63  ;;  %v751_v59 = vand.u32 2147483647, %v2054_v35  ;;  %v757_v36 = vmul.f32 -0.5, %v2075_v63  ;;  %v266_v48 = vld [vmem:[%s1509_s5 + $0xe8] sm:$0xff] }
  0xd1   : > { %v805_v12 = vadd.f32 %v717_v0, %v357_v4  ;;  %v726_v20 = vsel %vm2071_vm9, %v723_v23, %v720_v25  ;;  %v361_v17 = vsub.f32 %v297_v51, %v329_v55  ;;  %v750_v62 = vmul.f32 %v2054_v35, %v749_v3  ;;  %v267_v35 = vld [vmem:[%s1509_s5 + $0xf0] sm:$0xff] }
  0xd2   : > { %v806_v29 = vadd.f32 %v726_v20, %v358_v19  ;;  %1185 = vlog2.f32 %v754_v45  ;;  %v298_v1 = vmax.f32 %v1974_v27, 0.0  ;;  %vm752_vm12 = vcmp.lt.f32.partialorder %v751_v59, 0.0004427343 }
  0xd3   : > { %v1176_v21 = vpop.eup %1175  ;;  %v837_v14 = vsub.f32 0.0, %v805_v12  ;;  %v758_v4 = vadd.f32 1.0, %v757_v36  ;;  %v330_v5 = vmul.f32 %v266_v48, %v1974_v27  ;;  %v760_v30 = vand.u32 2147483647, %v2075_v63 }
  0xd4   : > { %v2096_v22 = vpop.eup %1177  ;;  %v838_v49 = vsub.f32 0.0, %v806_v29  ;;  %v729_v34 = vmul.f32 0.6931472, %v1176_v21  ;;  %v299_v39 = vmax.f32 %v2003_v33, 0.0  ;;  %v331_v10 = vmul.f32 %v267_v35, %v2003_v33 }
  0xd5   : > { %869 = vst [vmem:[%s1672_s20 + $0xc0] sm:$0xff] %v837_v14  ;;  %v763_v54 = vadd.f32 1.0, %v2096_v22  ;;  %v1180_v43 = vpop.eup %1179  ;;  %v766_v61 = vmul.f32 -0.5, %v2096_v22  ;;  %v759_v60 = vmul.f32 %v2075_v63, %v758_v4  ;;  %v362_v19 = vsub.f32 %v298_v1, %v330_v5 }
  0xd6   : > { %870 = vst [vmem:[%s1672_s20 + $0xc8] sm:$0xff] %v838_v49  ;;  %v735_v40 = vsel %vm2092_vm10, %v732_v42, %v729_v34  ;;  %v1182_v28 = vpop.eup %1181  ;;  %v738_v56 = vmul.f32 0.6931472, %v1180_v43  ;;  %vm761_vm13 = vcmp.lt.f32.partialorder %v760_v30, 0.0004427343  ;;  %v300_v31 = vmax.f32 %v2020_v32, 0.0 }
  0xd7   : > { %v807_v24 = vadd.f32 %v735_v40, %v359_v44  ;;  %1187 = vlog2.f32 %v763_v54  ;;  %v772_v26 = vadd.f32 1.0, %v1182_v28  ;;  %v775_v37 = vmul.f32 -0.5, %v1182_v28 }
  0xd8   : > { %v744_v57 = vsel %vm743_vm11, %v741_v52, %v738_v56  ;;  %v1184_v58 = vpop.eup %1183  ;;  %v767_v27 = vadd.f32 1.0, %v766_v61  ;;  %v769_v2 = vand.u32 2147483647, %v2096_v22  ;;  %v332_v12 = vmul.f32 %v268_v53, %v2020_v32 }
  0xd9   : > { %v839_v46 = vsub.f32 0.0, %v807_v24  ;;  %v808_v50 = vadd.f32 %v744_v57, %v360_v11  ;;  %1189 = vlog2.f32 %v772_v26  ;;  %v747_v18 = vmul.f32 0.6931472, %v1184_v58 }
  0xda   : > { %v776_v63 = vadd.f32 1.0, %v775_v37  ;;  %v768_v45 = vmul.f32 %v2096_v22, %v767_v27  ;;  %v778_v20 = vand.u32 2147483647, %v1182_v28  ;;  %v363_v41 = vsub.f32 %v299_v39, %v331_v10 }
  0xdb   : > { %871 = vst [vmem:[%s1672_s20 + $0xd0] sm:$0xff] %v839_v46  ;;  %v840_v6 = vsub.f32 0.0, %v808_v50  ;;  %v753_v23 = vsel %vm752_vm12, %v750_v62, %v747_v18  ;;  %vm770_vm14 = vcmp.lt.f32.partialorder %v769_v2, 0.0004427343  ;;  %v364_v21 = vsub.f32 %v300_v31, %v332_v12 }
  0xdc   : > { %v809_v16 = vadd.f32 %v753_v23, %v361_v17  ;;  %v777_v29 = vmul.f32 %v1182_v28, %v776_v63  ;;  %vm779_vm15 = vcmp.lt.f32.partialorder %v778_v20, 0.0004427343 }
  0xdd   : > { %872 = vst [vmem:[%s1672_s20 + $0xd8] sm:$0xff] %v840_v6 }
  0xde   : > { %v841_v9 = vsub.f32 0.0, %v809_v16 }
  0xdf   : > { %v1186_v15 = vpop.eup %1185 }
  0xe0   : > { %v756_v25 = vmul.f32 0.6931472, %v1186_v15  ;;  %873 = vst [vmem:[%s1672_s20 + $0xe0] sm:$0xff] %v841_v9 }
  0xe2   : > { %v762_v0 = vsel %vm761_vm13, %v759_v60, %v756_v25 }
  0xe3   : > { %v810_v8 = vadd.f32 %v762_v0, %v362_v19 }
  0xe4   : > { %v1188_v7 = vpop.eup %1187 }
  0xe5   : > { %v842_v33 = vsub.f32 0.0, %v810_v8  ;;  %v765_v38 = vmul.f32 0.6931472, %v1188_v7 }
  0xe6   : > { %v1190_v42 = vpop.eup %1189 }
  0xe7   : > { %874 = vst [vmem:[%s1672_s20 + $0xe8] sm:$0xff] %v842_v33  ;;  %v771_v13 = vsel %vm770_vm14, %v768_v45, %v765_v38  ;;  %v774_v44 = vmul.f32 0.6931472, %v1190_v42 }
  0xe8   : > { %v811_v14 = vadd.f32 %v771_v13, %v363_v41 }
  0xe9   : > { %v780_v47 = vsel %vm779_vm15, %v777_v29, %v774_v44 }
  0xea   : > { %v843_v32 = vsub.f32 0.0, %v811_v14  ;;  %v812_v22 = vadd.f32 %v780_v47, %v364_v21 }
  0xec   : > { %875 = vst [vmem:[%s1672_s20 + $0xf0] sm:$0xff] %v843_v32  ;;  %v844_v49 = vsub.f32 0.0, %v812_v22 }
  0xee   : > { %876 = vst [vmem:[%s1672_s20 + $0xf8] sm:$0xff] %v844_v49 }
  0xef   : > { %1260 = shalt.err (!%p1257_p3)
}
  0xf0   : > { %s1261_s25 = scalar_lea.hbm %s2133_s19, 4096  ;;  %s1265_s30 = scalar_lea.hbm %s2180_s2, 16384 }
  0xf1   : > { %p1262_p10 = scmp.ne.s32.totalorder %s2133_s19, %s1261_s25  ;;  %p1266_p5 = scmp.lt.s32.totalorder %s2133_s19, %s2180_s2 }
  0xf2   : > { %p1267_p8 = scmp.lt.s32.totalorder %s1265_s30, %s1261_s25 }
  0xf3   : > { %p1263_p11 = pnand %p1262_p10, %p2244_p0 }
  0xf4   : > { %p1268_p6 = por %p1267_p8, %p1266_p5 }
  0xf5   : > { %p1264_p4 = pneg %p1263_p11 }
  0xf7   : > { %p1269_p12 = pnand %p1268_p6, %p1264_p4 }
  0xf9   : > { %1272 = shalt.err (!%p1269_p12)
}
  0xfa   : > { %s1322_s29 = smov 128   ;;  %s1323_s5 = smov 8  }
  0xfb   : > { %1012 = dma.vmem_to_hbm [thread:$0]  (%p2244_p0), %s2135_s14, 4096, %s2133_s19, %s878_s24, %s1322_s29, %s1322_s29, %s1323_s5  }
  0xfc PF: > { %p1026_p2 = scmp.ge.s32.totalorder %s1315_s12, 2  ;;  %s906_s20 = sand.u32 1, %s1303_s9  }
  0xfd   : > { %p2245_p7 = scmp.ne.s32.totalorder %s2186_s22, 0  ;;  %s907_s6 = scalar_lea.sflag [#allocation4], %s906_s20 }
  0xff   : > { %p1022_p9 = pnand %p1026_p2, %p2245_p7 }
 0x101   : > { %p1023_p13 = pneg %p1022_p9 }
 0x103   : > { %1298 = dma.done.wait (%p1023_p13), %s907_s6, 4096  }
 0x104   : > { %1300 = vsyncadd (%p1023_p13), %s907_s6, 4294963200  ;;  %p18_p1 = scmp.ge.s32.totalorder %s1364_s15, 6   ;;  %s2246_s9 = smov %s1307_s10 }
 0x105   : > { %s2247_s10 = smov %s1311_s11  ;;  %s2248_s11 = smov %s1376_s18 }
 0x106   : > { %s2249_s12 = smov %s1364_s15  ;;  %20 = sbr.rel (!%p18_p1) target bundleno = 7 (0x7), region = 86 }
 0x10b   :  { %912 = vsyncpa [#allocation3], 1 }
 0x10c   :  { %914 = vsyncpa [#allocation3 + $0x1], 1 }
 0x10d   :  { %915 = vsyncpa [#allocation6], 1 }
 0x10e   :  { %917 = vsyncpa [#allocation6 + $0x1], 1 }
 0x10f   :  { %918 = vsyncpa [#allocation4], 1 }
 0x110   :  { %920 = vsyncpa [#allocation4 + $0x1], 1 }

</bundles_post_ra>
